<compile_context>
chip_gen: v6e
topology: v6e:2x2x1
jax: 0.10.0
libtpu: 0.0.40
codegen_flags: <defaults>
</compile_context>

<pallas_src>
import jax
import jax.numpy as jnp
from jax.experimental import pallas as pl
from jax.experimental.pallas import tpu as pltpu


def _round_up(x, m):
    return ((x + m - 1) // m) * m


def _vmem_budget_bytes():
    """~85% of per-core physical VMEM (64 MiB v7x, 128 MiB v5e/v6e)."""
    cap = None
    try:
        info = pltpu.get_tpu_info()
        cap = getattr(info, "vmem_capacity_bytes", None)
    except Exception:
        cap = None
    if not cap:
        cap = 64 << 20          # conservative fallback = v7x physical VMEM
    return int(cap * 0.85)


def _pick_tiles(B, E, L, block_b, block_n, budget, cd_bytes):
    """Pick (TB, TN) so the double-buffered working set fits the VMEM budget."""
    TB = max(8, min(_round_up(block_b, 8), _round_up(B, 8)))
    TN = _round_up(L, 128)
    if block_n is not None:
        TN = min(TN, max(128, _round_up(block_n, 128)))

    def cost(tb, tn):
        x_b = 2 * tb * E * 4           # activation tile (f32, double-buffered)
        w_b = 2 * tn * E * cd_bytes    # weight tile (bf16, double-buffered)
        bias_b = 2 * tn * 4
        lab_b = 2 * tb * 4
        out_b = 2 * tb * tn * 4        # logits tile (f32, double-buffered)
        scr_b = 3 * tb * 128 * 4 + 4 * 8 * 128 * 4
        return x_b + w_b + bias_b + lab_b + out_b + scr_b + (1 << 20)

    while cost(TB, TN) > budget and TN > 128:
        TN = max(128, _round_up(TN // 2, 128))
    while cost(TB, TN) > budget and TB > 8:
        TB = max(8, _round_up(TB // 2, 8))
    return TB, TN


# --------------------------------------------------------------------------
# kernels
# --------------------------------------------------------------------------
def _make_infer_kernel(compute_dtype):
    def kernel(x_ref, w_ref, b_ref, logits_ref):
        x = x_ref[...].astype(compute_dtype)
        w = w_ref[...].astype(compute_dtype)
        # (TB, E) . (TN, E) contracted on E -> (TB, TN), f32 MXU accumulation
        logits = jax.lax.dot_general(x, w, (((1,), (1,)), ((), ())),
                                     preferred_element_type=jnp.float32)
        logits_ref[...] = (logits + b_ref[...]).astype(logits_ref.dtype)
    return kernel


def _make_train_kernel(compute_dtype, ignore_index):
    # TODO(synk): nn.CrossEntropyLoss class weights / label smoothing / non-mean
    #             reductions are not supported (only default mean + ignore_index).
    def kernel(x_ref, w_ref, b_ref, lab_ref,
               logits_ref, lsum_ref, lcnt_ref,
               m_sc, l_sc, p_sc):
        j = pl.program_id(1)

        @pl.when(j == 0)
        def _():
            m_sc[...] = jnp.full(m_sc.shape, -jnp.inf, jnp.float32)
            l_sc[...] = jnp.zeros(l_sc.shape, jnp.float32)
            p_sc[...] = jnp.zeros(p_sc.shape, jnp.float32)

        # ---- linear layer: no transposed weight copy; bf16 MXU, f32 acc ----
        x = x_ref[...].astype(compute_dtype)
        w = w_ref[...].astype(compute_dtype)
        logits = jax.lax.dot_general(x, w, (((1,), (1,)), ((), ())),
                                     preferred_element_type=jnp.float32)
        # padded label columns carry a -1e30 bias -> no extra column mask needed
        logits = logits + b_ref[...]
        logits_ref[...] = logits.astype(logits_ref.dtype)

        # ---- online-softmax cross entropy across label tiles (axis j) ----
        tb, tn = logits.shape
        lab = lab_ref[...]                                      # (TB, 1) int32
        col = j * tn + jax.lax.broadcasted_iota(jnp.int32, (tb, tn), 1)

        m_prev = m_sc[...]
        m_new = jnp.maximum(m_prev, jnp.max(logits, axis=-1, keepdims=True))
        alpha = jnp.exp(m_prev - m_new)
        l_sc[...] = alpha * l_sc[...] + jnp.sum(jnp.exp(logits - m_new),
                                                axis=-1, keepdims=True)
        p_sc[...] = p_sc[...] + jnp.sum(jnp.where(col == lab, logits, 0.0),
                                        axis=-1, keepdims=True)
        m_sc[...] = m_new

        @pl.when(j == pl.num_programs(1) - 1)
        def _():
            lse = m_sc[...] + jnp.log(l_sc[...])
            per_example = lse - p_sc[...]                       # (TB, 1)
            valid = lab != ignore_index                         # padded rows hold ignore_index
            tile_sum = jnp.sum(jnp.where(valid, per_example, 0.0))
            tile_cnt = jnp.sum(valid.astype(jnp.float32))
            lsum_ref[...] = jnp.full(lsum_ref.shape, tile_sum, jnp.float32)
            lcnt_ref[...] = jnp.full(lcnt_ref.shape, tile_cnt, jnp.float32)
    return kernel


# --------------------------------------------------------------------------
# wrapper
# --------------------------------------------------------------------------
def classifier_forward(x, weight, bias, labels=None, *,
                       block_b=1024, block_n=None,
                       compute_dtype=jnp.bfloat16,
                       logits_dtype=jnp.float32,
                       ignore_index=-100):
    """Forward pass of `Classifier`: returns (loss, logits).

    x: (B, E); weight: (L, E) (torch nn.Linear layout); bias: (L,).
    loss is None when labels is None, else mean CE over targets != ignore_index
    (PyTorch nn.CrossEntropyLoss default semantics).
    """
    x = jnp.asarray(x)
    weight = jnp.asarray(weight)
    bias = jnp.asarray(bias)

    B, E = x.shape
    L = weight.shape[0]
    cd_bytes = jnp.dtype(compute_dtype).itemsize

    budget = _vmem_budget_bytes()
    TB, TN = _pick_tiles(B, E, L, block_b, block_n, budget, cd_bytes)
    Lp = _round_up(L, TN)
    B_pad = _round_up(B, TB)
    nb, nn = B_pad // TB, Lp // TN
    vmem_limit = int(max(min(budget, 112 << 20), 16 << 20))

    # parameter prep: pad L -> Lp, cast to the MXU dtype, fold the padded-column
    # mask into the bias.  No transpose is materialized.
    if Lp == L and weight.dtype == jnp.dtype(compute_dtype):
        w_in = weight
    else:
        w_in = jnp.zeros((Lp, E), compute_dtype).at[:L].set(
            weight.astype(compute_dtype))
    b_in = jnp.full((1, Lp), -1e30, jnp.float32).at[0, :L].set(
        bias.astype(jnp.float32))

    # activations stay in their input dtype (read exactly once; cast on-chip)
    x_in = x if B_pad == B else jnp.zeros((B_pad, E), x.dtype).at[:B].set(x)

    x_spec = pl.BlockSpec((TB, E), lambda i, j: (i, 0))
    w_spec = pl.BlockSpec((TN, E), lambda i, j: (j, 0))
    b_spec = pl.BlockSpec((1, TN), lambda i, j: (0, j))
    logits_spec = pl.BlockSpec((TB, TN), lambda i, j: (i, j))
    ld_bytes = jnp.dtype(logits_dtype).itemsize

    if labels is None:
        logits_pad = pl.pallas_call(
            _make_infer_kernel(compute_dtype),
            out_shape=jax.ShapeDtypeStruct((B_pad, Lp), logits_dtype),
            grid_spec=pltpu.PrefetchScalarGridSpec(
                num_scalar_prefetch=0,
                grid=(nb, nn),
                in_specs=[x_spec, w_spec, b_spec],
                out_specs=logits_spec,
            ),
            compiler_params=pltpu.CompilerParams(
                dimension_semantics=("parallel", "parallel"),
                vmem_limit_bytes=vmem_limit),
            cost_estimate=pl.CostEstimate(
                flops=int(2 * B_pad * E * Lp),
                transcendentals=0,
                bytes_accessed=int(x_in.size * x_in.dtype.itemsize
                                   + nb * Lp * E * cd_bytes + Lp * 4
                                   + B_pad * Lp * ld_bytes)),
        )(x_in, w_in, b_in)
        logits = logits_pad if (B_pad == B and Lp == L) else logits_pad[:B, :L]
        return None, logits

    labels = jnp.asarray(labels).reshape(B).astype(jnp.int32)
    lab_in = jnp.full((B_pad, 1), ignore_index, jnp.int32)
    lab_in = lab_in.at[:B, 0].set(labels)

    logits_pad, lsum, lcnt = pl.pallas_call(
        _make_train_kernel(compute_dtype, ignore_index),
        out_shape=(
            jax.ShapeDtypeStruct((B_pad, Lp), logits_dtype),    # logits
            jax.ShapeDtypeStruct((nb * 8, 128), jnp.float32),   # per-tile loss sums
            jax.ShapeDtypeStruct((nb * 8, 128), jnp.float32),   # per-tile valid counts
        ),
        grid_spec=pltpu.PrefetchScalarGridSpec(
            num_scalar_prefetch=0,
            grid=(nb, nn),
            in_specs=[x_spec, w_spec, b_spec,
                      pl.BlockSpec((TB, 1), lambda i, j: (i, 0))],
            out_specs=(
                logits_spec,
                pl.BlockSpec((8, 128), lambda i, j: (i, 0)),
                pl.BlockSpec((8, 128), lambda i, j: (i, 0)),
            ),
            scratch_shapes=[pltpu.VMEM((TB, 1), jnp.float32)] * 3,
        ),
        compiler_params=pltpu.CompilerParams(
            dimension_semantics=("parallel", "arbitrary"),   # batch parallel (megacore)
            vmem_limit_bytes=vmem_limit),
        cost_estimate=pl.CostEstimate(
            flops=int(2 * B_pad * E * Lp),
            transcendentals=int(B_pad * Lp + B_pad),
            bytes_accessed=int(x_in.size * x_in.dtype.itemsize
                               + nb * Lp * E * cd_bytes + Lp * 4 + B_pad * 4
                               + B_pad * Lp * ld_bytes)),
    )(x_in, w_in, b_in, lab_in)

    loss = (jnp.sum(lsum.reshape(nb, 8, 128)[:, 0, 0])
            / jnp.sum(lcnt.reshape(nb, 8, 128)[:, 0, 0]))
    logits = logits_pad if (B_pad == B and Lp == L) else logits_pad[:B, :L]
    return loss, logits


# --------------------------------------------------------------------------
# reference + test
# --------------------------------------------------------------------------
def _reference(x, weight, bias, labels, compute_dtype=jnp.bfloat16,
               ignore_index=-100):
    # mirrors the kernel's compute dtypes: bf16 matmul inputs, f32 everywhere else
    logits = jax.lax.dot_general(
        x.astype(compute_dtype), weight.astype(compute_dtype),
        (((1,), (1,)), ((), ())),
        preferred_element_type=jnp.float32) + bias.astype(jnp.float32)
    if labels is None:
        return None, logits
    m = jnp.max(logits, axis=-1, keepdims=True)
    lse = m + jnp.log(jnp.sum(jnp.exp(logits - m), axis=-1, keepdims=True))
    safe_labels = jnp.where(labels < 0, 0, labels)
    picked = jnp.take_along_axis(logits, safe_labels[:, None], axis=-1)
    per_ex = (lse - picked)[:, 0]
    valid = labels != ignore_index
    loss = jnp.sum(jnp.where(valid, per_ex, 0.0)) / jnp.sum(valid.astype(jnp.float32))
    return loss, logits


if __name__ == "__main__":
    key = jax.random.PRNGKey(0)
    (k_x, k_w, k_b, k_lab, k_x2, k_lab2,
     k_w3, k_b3, k_x3, k_lab3) = jax.random.split(key, 10)

    emb_dim, num_labels = 32, 2
    bound = 1.0 / (emb_dim ** 0.5)
    W = jax.random.uniform(k_w, (num_labels, emb_dim), jnp.float32, -bound, bound)
    b = jax.random.uniform(k_b, (num_labels,), jnp.float32, -bound, bound)

    # case 1: small batch, training path (single batch tile, single label tile)
    batch = 8
    x = jax.random.normal(k_x, (batch, emb_dim), dtype=jnp.float32)
    labels = jax.random.randint(k_lab, (batch,), 0, num_labels, dtype=jnp.int32)
    loss, logits = classifier_forward(x, W, b, labels)
    jax.block_until_ready((loss, logits))
    ref_loss, ref_logits = _reference(x, W, b, labels)
    assert logits.shape == (batch, num_labels)
    assert jnp.allclose(logits, ref_logits, atol=1e-4, rtol=1e-4)
    assert jnp.allclose(loss, ref_loss, atol=2e-4, rtol=2e-4)

    # inference path (labels=None) -> specialized fully-parallel kernel
    loss_none, logits_inf = classifier_forward(x, W, b, None)
    jax.block_until_ready(logits_inf)
    assert loss_none is None
    assert jnp.allclose(logits_inf, ref_logits, atol=1e-4, rtol=1e-4)

    # case 2: ragged batch (13) + multiple batch tiles exercises row padding,
    # the parallel batch axis, and per-tile partial loss sums
    batch2 = 13
    x2 = jax.random.normal(k_x2, (batch2, emb_dim), dtype=jnp.float32)
    labels2 = jax.random.randint(k_lab2, (batch2,), 0, num_labels, dtype=jnp.int32)
    loss2, logits2 = classifier_forward(x2, W, b, labels2, block_b=8)
    jax.block_until_ready((loss2, logits2))
    ref_loss2, ref_logits2 = _reference(x2, W, b, labels2)
    assert jnp.allclose(logits2, ref_logits2, atol=1e-4, rtol=1e-4)
    assert jnp.allclose(loss2, ref_loss2, atol=2e-4, rtol=2e-4)

    # case 3: larger label space split across label tiles (online softmax) plus
    # ignore_index=-100 rows (PyTorch CrossEntropyLoss default semantics)
    num_labels3 = 200
    W3 = jax.random.uniform(k_w3, (num_labels3, emb_dim), jnp.float32, -bound, bound)
    b3 = jax.random.uniform(k_b3, (num_labels3,), jnp.float32, -bound, bound)
    batch3 = 24
    x3 = jax.random.normal(k_x3, (batch3, emb_dim), dtype=jnp.float32)
    labels3 = jax.random.randint(k_lab3, (batch3,), 0, num_labels3, dtype=jnp.int32)
    labels3 = labels3.at[3].set(-100).at[17].set(-100)
    loss3, logits3 = classifier_forward(x3, W3, b3, labels3, block_b=16, block_n=128)
    jax.block_until_ready((loss3, logits3))
    ref_loss3, ref_logits3 = _reference(x3, W3, b3, labels3)
    assert logits3.shape == (batch3, num_labels3)
    assert jnp.allclose(logits3, ref_logits3, atol=1e-4, rtol=1e-4)
    assert jnp.allclose(loss3, ref_loss3, atol=5e-4, rtol=5e-4)

    print("KERNEL_OK")
</pallas_src>

<mosaic_0001>
module attributes {stable_mosaic.version = 11 : i64} {
  func.func @kernel(%arg0: i32, %arg1: i32, %arg2: memref<8x32xf32, #tpu.memory_space<vmem>>, %arg3: memref<128x32xbf16, #tpu.memory_space<vmem>>, %arg4: memref<1x128xf32, #tpu.memory_space<vmem>>, %arg5: memref<8x1xi32, #tpu.memory_space<vmem>>, %arg6: memref<8x128xf32, #tpu.memory_space<vmem>>, %arg7: memref<8x128xf32, #tpu.memory_space<vmem>>, %arg8: memref<8x128xf32, #tpu.memory_space<vmem>>, %arg9: memref<8x1xf32, #tpu.memory_space<vmem>>, %arg10: memref<8x1xf32, #tpu.memory_space<vmem>>, %arg11: memref<8x1xf32, #tpu.memory_space<vmem>>) attributes {dimension_semantics = [#tpu.dimension_semantics<parallel>, #tpu.dimension_semantics<arbitrary>], iteration_bounds = array<i64: 1, 1>, scalar_prefetch = 0 : i64, scratch_operands = 3 : i64, tpu.core_type = #tpu.core_type<tc>, window_params = [{transform_indices = @transform_0, window_bounds = array<i64: 8, 32>}, {transform_indices = @transform_1, window_bounds = array<i64: 128, 32>}, {transform_indices = @transform_2, window_bounds = array<i64: 1, 128>}, {transform_indices = @transform_3, window_bounds = array<i64: 8, 1>}, {transform_indices = @transform_4, window_bounds = array<i64: 8, 128>}, {transform_indices = @transform_5, window_bounds = array<i64: 8, 128>}, {transform_indices = @transform_6, window_bounds = array<i64: 8, 128>}]} {
    %c0_i32 = arith.constant 0 : i32
    %0 = arith.cmpi eq, %arg1, %c0_i32 : i32
    %1 = arith.extui %0 : i1 to i32
    %c0_i32_0 = arith.constant 0 : i32
    %2 = arith.cmpi ne, %1, %c0_i32_0 : i32
    scf.if %2 {
      %cst_28 = arith.constant 0xFF800000 : f32
      %44 = vector.broadcast %cst_28 : f32 to vector<8x1xf32>
      %c0_29 = arith.constant 0 : index
      %c0_30 = arith.constant 0 : index
      %45 = vector.load %arg9[%c0_29, %c0_30] : memref<8x1xf32, #tpu.memory_space<vmem>>, vector<8x1xf32>
      tpu.vector_store %arg9[%c0_29, %c0_30], %44 {strides = array<i32>} : memref<8x1xf32, #tpu.memory_space<vmem>>, vector<8x1xf32>,
      %cst_31 = arith.constant 0.000000e+00 : f32
      %46 = vector.broadcast %cst_31 : f32 to vector<8x1xf32>
      %c0_32 = arith.constant 0 : index
      %c0_33 = arith.constant 0 : index
      %47 = vector.load %arg10[%c0_32, %c0_33] : memref<8x1xf32, #tpu.memory_space<vmem>>, vector<8x1xf32>
      tpu.vector_store %arg10[%c0_32, %c0_33], %46 {strides = array<i32>} : memref<8x1xf32, #tpu.memory_space<vmem>>, vector<8x1xf32>,
      %cst_34 = arith.constant 0.000000e+00 : f32
      %48 = vector.broadcast %cst_34 : f32 to vector<8x1xf32>
      %c0_35 = arith.constant 0 : index
      %c0_36 = arith.constant 0 : index
      %49 = vector.load %arg11[%c0_35, %c0_36] : memref<8x1xf32, #tpu.memory_space<vmem>>, vector<8x1xf32>
      tpu.vector_store %arg11[%c0_35, %c0_36], %48 {strides = array<i32>} : memref<8x1xf32, #tpu.memory_space<vmem>>, vector<8x1xf32>,
    } else {
    }
    %c0 = arith.constant 0 : index
    %c0_1 = arith.constant 0 : index
    %3 = vector.load %arg2[%c0, %c0_1] : memref<8x32xf32, #tpu.memory_space<vmem>>, vector<8x32xf32>
    %4 = arith.truncf %3 : vector<8x32xf32> to vector<8x32xbf16>
    %c0_2 = arith.constant 0 : index
    %c0_3 = arith.constant 0 : index
    %5 = vector.load %arg3[%c0_2, %c0_3] : memref<128x32xbf16, #tpu.memory_space<vmem>>, vector<128x32xbf16>
    %cst = arith.constant dense<0.000000e+00> : vector<8x128xf32>
    %6 = tpu.matmul %4, %5, %cst {dimension_numbers = #tpu.dot_dimension_numbers<[1], [1], [0], [0], [0, 0, 1, 0], [], []>} : vector<8x32xbf16>, vector<128x32xbf16>, vector<8x128xf32> -> vector<8x128xf32>
    %c0_4 = arith.constant 0 : index
    %c0_5 = arith.constant 0 : index
    %7 = vector.load %arg4[%c0_4, %c0_5] : memref<1x128xf32, #tpu.memory_space<vmem>>, vector<1x128xf32>
    %8 = vector.broadcast %7 : vector<1x128xf32> to vector<8x128xf32>
    %9 = arith.addf %6, %8 : vector<8x128xf32>
    %c0_6 = arith.constant 0 : index
    %c0_7 = arith.constant 0 : index
    %10 = vector.load %arg6[%c0_6, %c0_7] : memref<8x128xf32, #tpu.memory_space<vmem>>, vector<8x128xf32>
    tpu.vector_store %arg6[%c0_6, %c0_7], %9 {strides = array<i32>} : memref<8x128xf32, #tpu.memory_space<vmem>>, vector<8x128xf32>,
    %c0_8 = arith.constant 0 : index
    %c0_9 = arith.constant 0 : index
    %11 = vector.load %arg5[%c0_8, %c0_9] : memref<8x1xi32, #tpu.memory_space<vmem>>, vector<8x1xi32>
    %c128_i32 = arith.constant 128 : i32
    %12 = arith.muli %arg1, %c128_i32 : i32
    %13 = tpu.iota {dimensions = array<i32: 1>} : vector<8x128xi32>
    %14 = vector.broadcast %12 : i32 to vector<8x128xi32>
    %15 = arith.addi %14, %13 : vector<8x128xi32>
    %c0_10 = arith.constant 0 : index
    %c0_11 = arith.constant 0 : index
    %16 = vector.load %arg9[%c0_10, %c0_11] : memref<8x1xf32, #tpu.memory_space<vmem>>, vector<8x1xf32>
    %cst_12 = arith.constant dense<0xFF800000> : vector<8xf32>
    %17 = vector.multi_reduction <maximumf>, %9, %cst_12 [1] : vector<8x128xf32> to vector<8xf32>
    %18 = vector.shape_cast %17 : vector<8xf32> to vector<8x1xf32>
    %19 = arith.maximumf %16, %18 : vector<8x1xf32>
    %20 = arith.subf %16, %19 : vector<8x1xf32>
    %21 = math.exp %20 : vector<8x1xf32>
    %c0_13 = arith.constant 0 : index
    %c0_14 = arith.constant 0 : index
    %22 = vector.load %arg10[%c0_13, %c0_14] : memref<8x1xf32, #tpu.memory_space<vmem>>, vector<8x1xf32>
    %23 = arith.mulf %21, %22 : vector<8x1xf32>
    %24 = vector.broadcast %19 : vector<8x1xf32> to vector<8x128xf32>
    %25 = arith.subf %9, %24 : vector<8x128xf32>
    %26 = math.exp %25 : vector<8x128xf32>
    %cst_15 = arith.constant dense<0.000000e+00> : vector<8xf32>
    %27 = vector.multi_reduction <add>, %26, %cst_15 [1] : vector<8x128xf32> to vector<8xf32>
    %28 = vector.shape_cast %27 : vector<8xf32> to vector<8x1xf32>
    %29 = arith.addf %23, %28 : vector<8x1xf32>
    %c0_16 = arith.constant 0 : index
    %c0_17 = arith.constant 0 : index
    %30 = vector.load %arg10[%c0_16, %c0_17] : memref<8x1xf32, #tpu.memory_space<vmem>>, vector<8x1xf32>
    tpu.vector_store %arg10[%c0_16, %c0_17], %29 {strides = array<i32>} : memref<8x1xf32, #tpu.memory_space<vmem>>, vector<8x1xf32>,
    %c0_18 = arith.constant 0 : index
    %c0_19 = arith.constant 0 : index
    %31 = vector.load %arg11[%c0_18, %c0_19] : memref<8x1xf32, #tpu.memory_space<vmem>>, vector<8x1xf32>
    %32 = vector.broadcast %11 : vector<8x1xi32> to vector<8x128xi32>
    %33 = arith.cmpi eq, %15, %32 : vector<8x128xi32>
    %cst_20 = arith.constant 0.000000e+00 : f32
    %34 = vector.broadcast %cst_20 : f32 to vector<8x128xf32>
    %35 = arith.select %33, %9, %34 : vector<8x128xi1>, vector<8x128xf32>
    %cst_21 = arith.constant dense<0.000000e+00> : vector<8xf32>
    %36 = vector.multi_reduction <add>, %35, %cst_21 [1] : vector<8x128xf32> to vector<8xf32>
    %37 = vector.shape_cast %36 : vector<8xf32> to vector<8x1xf32>
    %38 = arith.addf %31, %37 : vector<8x1xf32>
    %c0_22 = arith.constant 0 : index
    %c0_23 = arith.constant 0 : index
    %39 = vector.load %arg11[%c0_22, %c0_23] : memref<8x1xf32, #tpu.memory_space<vmem>>, vector<8x1xf32>
    tpu.vector_store %arg11[%c0_22, %c0_23], %38 {strides = array<i32>} : memref<8x1xf32, #tpu.memory_space<vmem>>, vector<8x1xf32>,
    %c0_24 = arith.constant 0 : index
    %c0_25 = arith.constant 0 : index
    %40 = vector.load %arg9[%c0_24, %c0_25] : memref<8x1xf32, #tpu.memory_space<vmem>>, vector<8x1xf32>
    tpu.vector_store %arg9[%c0_24, %c0_25], %19 {strides = array<i32>} : memref<8x1xf32, #tpu.memory_space<vmem>>, vector<8x1xf32>,
    %c0_i32_26 = arith.constant 0 : i32
    %41 = arith.cmpi eq, %arg1, %c0_i32_26 : i32
    %42 = arith.extui %41 : i1 to i32
    %c0_i32_27 = arith.constant 0 : i32
    %43 = arith.cmpi ne, %42, %c0_i32_27 : i32
    scf.if %43 {
      %c0_28 = arith.constant 0 : index
      %c0_29 = arith.constant 0 : index
      %44 = vector.load %arg9[%c0_28, %c0_29] : memref<8x1xf32, #tpu.memory_space<vmem>>, vector<8x1xf32>
      %c0_30 = arith.constant 0 : index
      %c0_31 = arith.constant 0 : index
      %45 = vector.load %arg10[%c0_30, %c0_31] : memref<8x1xf32, #tpu.memory_space<vmem>>, vector<8x1xf32>
      %46 = math.log %45 : vector<8x1xf32>
      %47 = arith.addf %44, %46 : vector<8x1xf32>
      %c0_32 = arith.constant 0 : index
      %c0_33 = arith.constant 0 : index
      %48 = vector.load %arg11[%c0_32, %c0_33] : memref<8x1xf32, #tpu.memory_space<vmem>>, vector<8x1xf32>
      %49 = arith.subf %47, %48 : vector<8x1xf32>
      %c-100_i32 = arith.constant -100 : i32
      %50 = vector.broadcast %c-100_i32 : i32 to vector<8x1xi32>
      %51 = arith.cmpi ne, %11, %50 : vector<8x1xi32>
      %cst_34 = arith.constant 0.000000e+00 : f32
      %52 = vector.broadcast %cst_34 : f32 to vector<8x1xf32>
      %53 = arith.select %51, %49, %52 : vector<8x1xi1>, vector<8x1xf32>
      %54 = vector.shape_cast %53 : vector<8x1xf32> to vector<1x8x1xf32>
      %cst_35 = arith.constant dense<0.000000e+00> : vector<1xf32>
      %55 = vector.multi_reduction <add>, %54, %cst_35 [1, 2] : vector<1x8x1xf32> to vector<1xf32>
      %56 = vector.shape_cast %55 : vector<1xf32> to vector<1x1x1xf32>
      %57 = vector.extract %56[0, 0, 0] : f32 from vector<1x1x1xf32>
      %58 = arith.extui %51 : vector<8x1xi1> to vector<8x1xi32>
      %59 = arith.sitofp %58 : vector<8x1xi32> to vector<8x1xf32>
      %60 = vector.shape_cast %59 : vector<8x1xf32> to vector<1x8x1xf32>
      %cst_36 = arith.constant dense<0.000000e+00> : vector<1xf32>
      %61 = vector.multi_reduction <add>, %60, %cst_36 [1, 2] : vector<1x8x1xf32> to vector<1xf32>
      %62 = vector.shape_cast %61 : vector<1xf32> to vector<1x1x1xf32>
      %63 = vector.extract %62[0, 0, 0] : f32 from vector<1x1x1xf32>
      %64 = vector.broadcast %57 : f32 to vector<8x128xf32>
      %c0_37 = arith.constant 0 : index
      %c0_38 = arith.constant 0 : index
      %65 = vector.load %arg7[%c0_37, %c0_38] : memref<8x128xf32, #tpu.memory_space<vmem>>, vector<8x128xf32>
      tpu.vector_store %arg7[%c0_37, %c0_38], %64 {strides = array<i32>} : memref<8x128xf32, #tpu.memory_space<vmem>>, vector<8x128xf32>,
      %66 = vector.broadcast %63 : f32 to vector<8x128xf32>
      %c0_39 = arith.constant 0 : index
      %c0_40 = arith.constant 0 : index
      %67 = vector.load %arg8[%c0_39, %c0_40] : memref<8x128xf32, #tpu.memory_space<vmem>>, vector<8x128xf32>
      tpu.vector_store %arg8[%c0_39, %c0_40], %66 {strides = array<i32>} : memref<8x128xf32, #tpu.memory_space<vmem>>, vector<8x128xf32>,
    } else {
    }
    return
  }
  func.func @transform_0(%arg0: i32, %arg1: i32) -> (i32, i32) {
    %c0_i32 = arith.constant 0 : i32
    %c0_i32_0 = arith.constant 0 : i32
    return %arg0, %c0_i32 : i32, i32
  }
  func.func @transform_1(%arg0: i32, %arg1: i32) -> (i32, i32) {
    %c0_i32 = arith.constant 0 : i32
    %c0_i32_0 = arith.constant 0 : i32
    return %arg1, %c0_i32 : i32, i32
  }
  func.func @transform_2(%arg0: i32, %arg1: i32) -> (i32, i32) {
    %c0_i32 = arith.constant 0 : i32
    %c0_i32_0 = arith.constant 0 : i32
    return %c0_i32, %arg1 : i32, i32
  }
  func.func @transform_3(%arg0: i32, %arg1: i32) -> (i32, i32) {
    %c0_i32 = arith.constant 0 : i32
    %c0_i32_0 = arith.constant 0 : i32
    return %arg0, %c0_i32 : i32, i32
  }
  func.func @transform_4(%arg0: i32, %arg1: i32) -> (i32, i32) {
    %c0_i32 = arith.constant 0 : i32
    return %arg0, %arg1 : i32, i32
  }
  func.func @transform_5(%arg0: i32, %arg1: i32) -> (i32, i32) {
    %c0_i32 = arith.constant 0 : i32
    %c0_i32_0 = arith.constant 0 : i32
    return %arg0, %c0_i32 : i32, i32
  }
  func.func @transform_6(%arg0: i32, %arg1: i32) -> (i32, i32) {
    %c0_i32 = arith.constant 0 : i32
    %c0_i32_0 = arith.constant 0 : i32
    return %arg0, %c0_i32 : i32, i32
  }
}

</mosaic_0001>

<bundles_post_ra>
// kernel: tpu_custom_call.1
= control target key start
LH: loop header
LB: loop body
LE: loop exit
PB: predicated region body
PF: predicated region fallthrough
CT: control target
= control target key end

     0   :  { %12 = vsyncpa [#allocation6], 0  ;;  %v414_v1 = vmov 0.0   ;;  %vm96_vm0 = vcmask 261120   ;;  %vm415_vm1 = vmmov 0   ;;  %v416_v6 = vmov 0   ;;  %s535_s0 = inlined_call_operand.vmem [shape: f32[8,32], index: 0, kind: input, shape index: {}]   ;;  %s536_s1 = inlined_call_operand.vmem [shape: bf16[128,32], index: 1, kind: input, shape index: {}]   ;;  %s537_s2 = inlined_call_operand.vmem [shape: f32[1,128], index: 2, kind: input, shape index: {}]   ;;  %s538_s3 = inlined_call_operand.vmem [shape: s32[8,1], index: 3, kind: input, shape index: {}]   ;;  %s539_s4 = inlined_call_operand.hbm [shape: f32[8,128], index: 4, kind: output, shape index: {0}]   ;;  %s540_s5 = inlined_call_operand.hbm [shape: f32[8,128], index: 5, kind: output, shape index: {1}]   ;;  %s541_s6 = inlined_call_operand.hbm [shape: f32[8,128], index: 6, kind: output, shape index: {2}]  }
   0x1   :  { %v336_v0 = vld [vmem:[%s536_s1 + $0x38] sm:$0xff]   ;;  %303 = vmatprep.subr.bf16.mxu0 %v414_v1  ;;  %v337_v3 = vld [vmem:[%s536_s1 + $0x30] sm:$0xff]   ;;  %v469_v5 = vld [vmem:[%s538_s3] sm:$0xff]  ;;  %319 = vmatprep.mubr.msk.bf16.mxu0 %vm415_vm1, %v414_v1 }
   0x2   :  { %v122_v2 = vsel %vm96_vm0, %v336_v0, 0  ;;  %v119_v4 = vsel %vm96_vm0, %v337_v3, 0  ;;  %335 = vset.pattern.permute.xlu1 %v416_v6 }
   0x3   :  { %304 = vmatpush3.bf16.xpose.msra.mxu0 %v122_v2 }
   0x4   :  { %305 = vmatprep.subr.bf16.mxu0 %v414_v1 }
   0x5   :  { %13 = vsyncpa [#allocation8], 0  ;;  %195 = vperm.xlu1 %335, %v469_v5   ;;  %334 = vset.pattern.permute.xlu0 %v416_v6  ;;  %v338_v7 = vld [vmem:[%s536_s1 + $0x28] sm:$0xff]   ;;  %v339_v9 = vld [vmem:[%s536_s1 + $0x20] sm:$0xff]   ;;  %vm27_vm2 = vcmask 7168   ;;  %v417_v26 = vmov -inf   ;;  %v167_v35 = vlaneseq }
   0x6   :  { %v116_v8 = vsel %vm96_vm0, %v338_v7, 0  ;;  %v113_v10 = vsel %vm96_vm0, %v339_v9, 0  ;;  %v340_v11 = vld [vmem:[%s536_s1 + $0x18] sm:$0xff]   ;;  %v341_v13 = vld [vmem:[%s536_s1 + $0x10] sm:$0xff]   ;;  %v342_v15 = vld [vmem:[%s536_s1 + $0x8] sm:$0xff]   ;;  %28 = vst.msk [vmem:[#allocation2] sm:$0xff] %vm27_vm2, %v417_v26 }
   0x7   :  { %v110_v12 = vsel %vm96_vm0, %v340_v11, 0  ;;  %v107_v14 = vsel %vm96_vm0, %v341_v13, 0  ;;  %v104_v16 = vsel %vm96_vm0, %v342_v15, 0  ;;  %v343_v17 = vld [vmem:[%s536_s1] sm:$0xff]   ;;  %29 = vst.msk [vmem:[#allocation3] sm:$0xff] %vm27_vm2, %v414_v1  ;;  %30 = vst.msk [vmem:[#allocation4] sm:$0xff] %vm27_vm2, %v414_v1 }
   0x8   :  { %v101_v18 = vsel %vm96_vm0, %v343_v17, 0  ;;  %v31_v19 = vld [vmem:[%s535_s0] sm:$0xff]  ;;  %v168_v36 = vand.u32 127, %v167_v35  ;;  %vm214_vm4 = vcmp.ne.s32.totalorder %v469_v5, 4294967196  ;;  %s418_s0 = smov [#allocation5]  }
   0x9   :  { %v32_v20 = vpack.c.bf16 %v31_v19, %v31_v19  ;;  %v283_v21 = vld [vmem:[%s537_s2] ss:$0 sm:$0xff]  ;;  %v293_v40 = vsel %vm214_vm4, 1.0, %v414_v1  ;;  %s248_s1 = sshll.u32 %s418_s0, 4  ;;  %s249_s1 = int_to_ptr.vmem [resolvable:$true] %s248_s1 }
   0xa   :  { %v228_v41 = vsel %vm27_vm2, %v293_v40, 0.0  ;;  %s350_s2 = scalar_lea.vmem %s249_s1, 128  ;;  %p355_p1 = scmp.lt.s32.totalorder %s249_s1, %s249_s1 }
   0xb   :  { %306 = vmatpush3.bf16.xpose.msra.mxu0 %v119_v4  ;;  %p351_p0 = scmp.ne.s32.totalorder %s249_s1, %s350_s2  ;;  %p356_p2 = scmp.lt.s32.totalorder %s350_s2, %s350_s2 }
   0xc   :  { %307 = vmatprep.subr.bf16.mxu0 %v414_v1 }
   0xd   :  { %v171_v28 = vld [vmem:[#allocation2] sm:$0xff]  ;;  %p357_p3 = por %p356_p2, %p355_p1 }
   0xe   :  { %v178_v44 = vld [vmem:[#allocation3] sm:$0xff]  ;;  %v193_v48 = vld [vmem:[#allocation4] sm:$0xff] }
   0xf   :  { %p358_p4 = pnand %p357_p3, %p351_p0 }
  0x13   :  { %308 = vmatpush3.bf16.xpose.msra.mxu0 %v116_v8 }
  0x14   :  { %309 = vmatprep.subr.bf16.mxu0 %v414_v1 }
  0x1b   :  { %310 = vmatpush3.bf16.xpose.msra.mxu0 %v113_v10 }
  0x1c   :  { %311 = vmatprep.subr.bf16.mxu0 %v414_v1 }
  0x23   :  { %312 = vmatpush3.bf16.xpose.msra.mxu0 %v110_v12 }
  0x24   :  { %313 = vmatprep.subr.bf16.mxu0 %v414_v1 }
  0x2b   :  { %314 = vmatpush3.bf16.xpose.msra.mxu0 %v107_v14 }
  0x2c   :  { %315 = vmatprep.subr.bf16.mxu0 %v414_v1 }
  0x33   :  { %316 = vmatpush3.bf16.xpose.msra.mxu0 %v104_v16 }
  0x34   :  { %317 = vmatprep.subr.bf16.mxu0 %v414_v1 }
  0x3b   :  { %318 = vmatpush3.bf16.xpose.msra.mxu0 %v101_v18 }
  0x42   :  { %320 = vmatmul.mubr.msk.bf16.vlgmr.msra.gmra.mxu0 %vm96_vm0, %v32_v20 }
  0x80   :  { %v196_v37 = vpop.permute.xlu1 %195 }
  0x81   :  { %vm197_vm3 = vcmp.eq.s32.totalorder %v168_v36, %v196_v37 }
 0x102   :  { %v158_v22 = vpop.f32.mrf.mxu0 }
 0x103   :  { %v159_v23 = vadd.f32 %v283_v21, %v158_v22 }
 0x104   :  { %v321_v24 = vpop.f32.mrf.mxu0 }
 0x105   :  { %164 = vst [vmem:[#allocation5] sm:$0xff] %v159_v23  ;;  %172 = vmax.xlane.f32.xlu0 %v159_v23  ;;  %v198_v39 = vsel %vm197_vm3, %v159_v23, 0.0 }
 0x106   :  { %v161_v25 = vpop.f32.mrf.mxu0 }
 0x108   :  { %v322_v27 = vpop.f32.mrf.mxu0 }
 0x18e   :  { %v173_v29 = vpop.xlane.xlu0 %172 }
 0x18f   :  { %v174_v30 = vmax.f32 %v171_v28, %v173_v29 }
 0x191   :  { %v175_v31 = vsub.f32 %v171_v28, %v174_v30  ;;  %203 = vst.msk [vmem:[#allocation2] sm:$0xff] %vm27_vm2, %v174_v30  ;;  %182 = vperm.xlu0 %334, %v174_v30  }
 0x193   :  { %v176_v42 = vmul.f32 1.442695, %v175_v31 }
 0x198   :  { %v207_v54 = vld [vmem:[#allocation2] sm:$0xff] }
 0x1b0   :  { %229 = vadd.xlane.f32.xlu0 %v228_v41 }
 0x20c   :  { %v183_v32 = vpop.permute.xlu0 %182 }
 0x20d   :  { %v185_v33 = vsub.f32 %v159_v23, %v183_v32 }
 0x20f   :  { %v186_v34 = vmul.f32 1.442695, %v185_v33 }
 0x211   :  { %344 = vpow2.f32 %v186_v34 }
 0x212   :  { %346 = vpow2.f32 %v176_v42 }
 0x21e   :  { %v345_v38 = vpop.eup %344 }
 0x21f   :  { %188 = vadd.xlane.f32.xlu1 %v345_v38  ;;  %v347_v43 = vpop.eup %346 }
 0x220   :  { %v179_v45 = vmul.f32 %v347_v43, %v178_v44 }
 0x223   :  { %199 = vadd.xlane.f32.xlu1 %v198_v39 }
 0x2a8   :  { %v189_v46 = vpop.xlane.xlu1 %188 }
 0x2a9   :  { %v190_v47 = vadd.f32 %v189_v46, %v179_v45 }
 0x2ab   :  { %192 = vst.msk [vmem:[#allocation3] sm:$0xff] %vm27_vm2, %v190_v47 }
 0x2ac   :  { %v200_v49 = vpop.xlane.xlu1 %199 }
 0x2ad   :  { %v201_v50 = vadd.f32 %v200_v49, %v193_v48 }
 0x2af   :  { %202 = vst.msk [vmem:[#allocation4] sm:$0xff] %vm27_vm2, %v201_v50 }
 0x2b2   :  { %v208_v51 = vld [vmem:[#allocation3] sm:$0xff] }
 0x2b3   :  { %348 = vlog2.f32 %v208_v51 }
 0x2b6   :  { %v212_v56 = vld [vmem:[#allocation4] sm:$0xff] }
 0x2c0   :  { %v349_v52 = vpop.eup %348 }
 0x2c1   :  { %v210_v53 = vmul.f32 0.6931472, %v349_v52 }
 0x2c3   :  { %v211_v55 = vadd.f32 %v210_v53, %v207_v54 }
 0x2c5   :  { %v213_v57 = vsub.f32 %v211_v55, %v212_v56 }
 0x2c7   :  { %v215_v58 = vsel %vm214_vm4, %v213_v57, 0.0 }
 0x2c8   :  { %v216_v59 = vsel %vm27_vm2, %v215_v58, 0.0 }
 0x2c9   :  { %217 = vadd.xlane.f32.xlu1 %v216_v59 }
 0x2ca   :  { %361 = shalt.err (!%p358_p4)
}
 0x2cb   :  { %251 = dma.vmem_to_hbm [thread:$0]  %s249_s1, 128, %s539_s4, [#allocation6]   ;;  %v230_v60 = vpop.xlane.xlu0 %229 }
 0x2cc   :  { %v231_v61 = vrot.slane %v230_v60, 4  ;;  %s419_s20 = smov [#allocation7]   ;;  %s420_s22 = smov [#allocation9]  }
 0x2cd   :  { %s258_s21 = sshll.u32 %s419_s20, 4  ;;  %s268_s4 = sshll.u32 %s420_s22, 4  ;;  %s259_s21 = int_to_ptr.vmem [resolvable:$true] %s258_s21  ;;  %s269_s4 = int_to_ptr.vmem [resolvable:$true] %s268_s4 }
 0x2ce   :  { %v232_v62 = vadd.f32 %v231_v61, %v230_v60  ;;  %s370_s25 = scalar_lea.vmem %s259_s21, 128  ;;  %p375_p6 = scmp.lt.s32.totalorder %s259_s21, %s259_s21 }
 0x2cf   :  { %p371_p5 = scmp.ne.s32.totalorder %s259_s21, %s370_s25  ;;  %p376_p7 = scmp.lt.s32.totalorder %s370_s25, %s370_s25 }
 0x2d0   :  { %v233_v63 = vrot.slane %v232_v62, 2 }
 0x2d1   :  { %p377_p8 = por %p376_p7, %p375_p6 }
 0x2d2   :  { %v234_v3 = vadd.f32 %v233_v63, %v232_v62 }
 0x2d3   :  { %p378_p9 = pnand %p377_p8, %p371_p5 }
 0x2d4   :  { %v235_v6 = vrot.slane %v234_v3, 1 }
 0x2d6   :  { %v236_v9 = vadd.f32 %v235_v6, %v234_v3 }
 0x352   :  { %v218_v0 = vpop.xlane.xlu1 %217 }
 0x353   :  { %v219_v1 = vrot.slane %v218_v0, 4 }
 0x355   :  { %v220_v2 = vadd.f32 %v219_v1, %v218_v0 }
 0x357   :  { %v221_v4 = vrot.slane %v220_v2, 2 }
 0x359   :  { %v222_v5 = vadd.f32 %v221_v4, %v220_v2 }
 0x35b   :  { %v223_v7 = vrot.slane %v222_v5, 1 }
 0x35d   :  { %v224_v8 = vadd.f32 %v223_v7, %v222_v5 }
 0x35f   :  { %323 = vpush %v224_v8 }
 0x360   :  { %325 = vpush %v236_v9 }
 0x390   :  { %s324_s23 = spop %323 }
 0x391   :  { %v238_v10 = vstv %s324_s23  ;;  %s326_s24 = spop %325 }
 0x392   :  { %239 = vst [vmem:[#allocation7] sm:$0xff] %v238_v10  ;;  %v240_v11 = vstv %s326_s24 }
 0x393   :  { %241 = vst [vmem:[#allocation9] sm:$0xff] %v240_v11 }
 0x394   :  { %381 = shalt.err (!%p378_p9)
}
 0x395   :  { %261 = dma.vmem_to_hbm [thread:$0]  %s259_s21, 128, %s540_s5, [#allocation8]  }
 0x396   :  { %s390_s28 = scalar_lea.vmem %s269_s4, 128  ;;  %p395_p11 = scmp.lt.s32.totalorder %s269_s4, %s269_s4 }
 0x397   :  { %p391_p10 = scmp.ne.s32.totalorder %s269_s4, %s390_s28  ;;  %p396_p12 = scmp.lt.s32.totalorder %s390_s28, %s390_s28 }
 0x399   :  { %p397_p13 = por %p396_p12, %p395_p11 }
 0x39b   :  { %p398_p0 = pnand %p397_p13, %p391_p10 }
 0x39d   :  { %401 = shalt.err (!%p398_p0)
}
 0x39e   :  { %271 = dma.vmem_to_hbm [thread:$0]  %s269_s4, 128, %s541_s6, [#allocation8]  }
 0x39f   :  { %410 = dma.done.wait [#allocation6], 128  }
 0x3a0   :  { %411 = vsyncadd [#allocation6], 4294967168 }
 0x3a1   :  { %412 = dma.done.wait [#allocation8], 256  }
 0x3a2   :  { %413 = vsyncadd [#allocation8], 4294967040 }
 0x3a3   :  { %281 = vsyncpa [#allocation6], 1 }
 0x3a4   :  { %282 = vsyncpa [#allocation8], 1 }

</bundles_post_ra>
